<compile_context>
chip_gen: v7x
topology: tpu7x:2x2x1
jax: 0.10.0
libtpu: 0.0.40
codegen_flags: <defaults>
</compile_context>

<pallas_src>
import jax
import jax.numpy as jnp
from jax import lax
from jax.experimental import pallas as pl
from jax.experimental.pallas import tpu as pltpu

INPUT_SIZE = 13
HIDDEN_SIZE = 20
OUTPUT_SIZE = 3
NUM_LAYERS = 1

_PREC = lax.Precision.DEFAULT  # explicit: single-pass MXU matmuls


def _rnn_kernel(x_ref, h0_ref, p_ref, out_ref, hid_ref):
    """Single-layer tanh RNN over the full sequence + final linear layer.

    x_ref  : (T*Bp, I) time-major, batch padded to Bp (row = t*Bp + b)
    h0_ref : (Bp, H)   initial hidden state (padded rows are zeros)
    p_ref  : (I+2H+2, H) packed params:
               rows [0, I)        : W_ih^T            (I, H)
               rows [I, I+H)      : W_hh^T            (H, H)
               rows [I+H, I+2H)   : W_fc^T (cols 0:O) (H, O)
               row  I+2H          : b_ih + b_hh       (1, H)
               row  I+2H+1        : b_fc   (cols 0:O) (1, O)
    out_ref: (Bp, O)   fc(h_T)        (wrapper slices [:B])
    hid_ref: (Bp, H)   final hidden   (wrapper slices [:B])
    """
    TB, I = x_ref.shape
    Bp, H = h0_ref.shape
    O = out_ref.shape[1]
    T = TB // Bp

    # One-time load of the packed parameter slab; static value slices (cheap,
    # outside the recurrence).
    p = p_ref[...]
    wih_t = p[0:I, :]                                  # (I, H)
    whh_t = p[I:I + H, :]                              # (H, H)
    wfc_t = p[I + H:I + 2 * H, 0:O]                    # (H, O)
    b = p[I + 2 * H:I + 2 * H + 1, :]                  # (1, H)
    bfc = p[I + 2 * H + 1:I + 2 * H + 2, 0:O]          # (1, O)

    # --- hoisted input projection: ONE MXU matmul for all timesteps ---------
    xw = jnp.dot(x_ref[...], wih_t,
                 preferred_element_type=jnp.float32, precision=_PREC) + b

    # --- recurrence: statically unrolled; only h @ W_hh^T + tanh on the
    #     serial critical path; each xw slab is an 8-sublane-aligned slice ----
    h = h0_ref[...]
    for t in range(T):
        h = jnp.tanh(xw[t * Bp:(t + 1) * Bp, :] +
                     jnp.dot(h, whh_t,
                             preferred_element_type=jnp.float32,
                             precision=_PREC))

    hid_ref[...] = h
    out_ref[...] = (jnp.dot(h, wfc_t,
                            preferred_element_type=jnp.float32,
                            precision=_PREC) + bfc)


@jax.jit
def rnn_forward(x, h0, w_ih, w_hh, b_ih, b_hh, w_fc, b_fc):
    """Matches torch: out, hidden = rnn(x, h0); out = fc(out[:, -1, :]).

    x  : (B, T, I)  batch_first, like the PyTorch module
    h0 : (NUM_LAYERS, B, H)
    returns (out (B, O), hidden (NUM_LAYERS, B, H))
    """
    f32 = jnp.float32
    B, T, I = x.shape
    H = w_hh.shape[0]
    O = w_fc.shape[0]
    Bp = ((B + 7) // 8) * 8  # pad batch to the 8-sublane granularity

    # --- activations: time-major, batch-padded, flattened to (T*Bp, I) ------
    x_t = jnp.transpose(x.astype(f32), (1, 0, 2))               # (T, B, I)
    x_t = jnp.pad(x_t, ((0, 0), (0, Bp - B), (0, 0)))           # (T, Bp, I)
    x_flat = x_t.reshape(T * Bp, I)                             # (T*Bp, I)

    h0_p = jnp.pad(h0[0].astype(f32), ((0, Bp - B), (0, 0)))    # (Bp, H)

    # --- pack all params (pre-transposed) into one f32 slab -----------------
    wih_t = w_ih.astype(f32).T                                  # (I, H)
    whh_t = w_hh.astype(f32).T                                  # (H, H)
    wfc_t = jnp.zeros((H, H), f32).at[:, :O].set(w_fc.astype(f32).T)
    b_row = (b_ih + b_hh).astype(f32).reshape(1, H)
    bfc_row = jnp.zeros((1, H), f32).at[0, :O].set(b_fc.astype(f32))
    params = jnp.concatenate([wih_t, whh_t, wfc_t, b_row, bfc_row], axis=0)

    flops = 2 * T * Bp * I * H + 2 * T * Bp * H * H + 2 * Bp * H * O
    bytes_accessed = 4 * (x_flat.size + h0_p.size + params.size
                          + Bp * O + Bp * H)

    out_p, hid_p = pl.pallas_call(
        _rnn_kernel,
        out_shape=(jax.ShapeDtypeStruct((Bp, O), jnp.float32),
                   jax.ShapeDtypeStruct((Bp, H), jnp.float32)),
        in_specs=[pl.BlockSpec(memory_space=pltpu.MemorySpace.VMEM)] * 3,
        out_specs=(pl.BlockSpec(memory_space=pltpu.MemorySpace.VMEM),
                   pl.BlockSpec(memory_space=pltpu.MemorySpace.VMEM)),
        cost_estimate=pl.CostEstimate(
            flops=flops,
            transcendentals=T * Bp * H,
            bytes_accessed=bytes_accessed),
    )(x_flat, h0_p, params)

    out = out_p[:B]                                             # (B, O)
    hidden = hid_p[:B].reshape(NUM_LAYERS, B, H)                # (1, B, H)
    return out, hidden


def init_params(key):
    """Deterministic params matching nn.RNN / nn.Linear shapes & init style."""
    k = jax.random.split(key, 6)
    bound = 1.0 / jnp.sqrt(HIDDEN_SIZE)
    w_ih = jax.random.uniform(k[0], (HIDDEN_SIZE, INPUT_SIZE),
                              minval=-bound, maxval=bound)
    w_hh = jax.random.uniform(k[1], (HIDDEN_SIZE, HIDDEN_SIZE),
                              minval=-bound, maxval=bound)
    b_ih = jax.random.uniform(k[2], (HIDDEN_SIZE,), minval=-bound, maxval=bound)
    b_hh = jax.random.uniform(k[3], (HIDDEN_SIZE,), minval=-bound, maxval=bound)
    w_fc = jax.random.uniform(k[4], (OUTPUT_SIZE, HIDDEN_SIZE),
                              minval=-bound, maxval=bound)
    b_fc = jax.random.uniform(k[5], (OUTPUT_SIZE,), minval=-bound, maxval=bound)
    return w_ih, w_hh, b_ih, b_hh, w_fc, b_fc


if __name__ == "__main__":
    key = jax.random.PRNGKey(0)
    k_x, k_h, k_p = jax.random.split(key, 3)

    B, T = 4, 8
    x = jax.random.normal(k_x, (B, T, INPUT_SIZE), dtype=jnp.float32)
    # PyTorch forward draws h0 ~ randn each call; drawn deterministically here.
    h0 = jax.random.normal(k_h, (NUM_LAYERS, B, HIDDEN_SIZE), dtype=jnp.float32)

    params = init_params(k_p)

    out, hidden = rnn_forward(x, h0, *params)
    jax.block_until_ready((out, hidden))

    # pure-JAX reference of the recurrence + fc head (PyTorch semantics).
    # Tolerance accounts for single-pass (bf16-operand) MXU matmuls selected
    # via lax.Precision.DEFAULT inside the kernel.
    w_ih, w_hh, b_ih, b_hh, w_fc, b_fc = params
    h_ref = h0[0]
    for t in range(T):
        h_ref = jnp.tanh(x[:, t, :] @ w_ih.T + b_ih + h_ref @ w_hh.T + b_hh)
    out_ref = h_ref @ w_fc.T + b_fc

    assert out.shape == (B, OUTPUT_SIZE)
    assert hidden.shape == (NUM_LAYERS, B, HIDDEN_SIZE)
    assert jnp.allclose(out, out_ref, atol=2e-2, rtol=2e-2), (
        "fc output mismatch: max abs diff "
        f"{float(jnp.max(jnp.abs(out - out_ref)))}")
    assert jnp.allclose(hidden[0], h_ref, atol=2e-2, rtol=2e-2), (
        "hidden mismatch: max abs diff "
        f"{float(jnp.max(jnp.abs(hidden[0] - h_ref)))}")

    print("KERNEL_OK")
</pallas_src>

<mosaic_0001>
module attributes {stable_mosaic.version = 11 : i64} {
  func.func @_rnn_kernel(%arg0: memref<64x13xf32, #tpu.memory_space<vmem>>, %arg1: memref<8x20xf32, #tpu.memory_space<vmem>>, %arg2: memref<55x20xf32, #tpu.memory_space<vmem>>, %arg3: memref<8x3xf32, #tpu.memory_space<vmem>>, %arg4: memref<8x20xf32, #tpu.memory_space<vmem>>) attributes {dimension_semantics = [], scalar_prefetch = 0 : i64, scratch_operands = 0 : i64, tpu.core_type = #tpu.core_type<tc>} {
    %c0 = arith.constant 0 : index
    %c0_0 = arith.constant 0 : index
    %0 = vector.load %arg2[%c0, %c0_0] : memref<55x20xf32, #tpu.memory_space<vmem>>, vector<55x20xf32>
    %1 = vector.extract_strided_slice %0 {offsets = [0, 0], sizes = [13, 20], strides = [1, 1]} : vector<55x20xf32> to vector<13x20xf32>
    %2 = vector.extract_strided_slice %0 {offsets = [13, 0], sizes = [20, 20], strides = [1, 1]} : vector<55x20xf32> to vector<20x20xf32>
    %3 = vector.extract_strided_slice %0 {offsets = [33, 0], sizes = [20, 3], strides = [1, 1]} : vector<55x20xf32> to vector<20x3xf32>
    %4 = vector.extract_strided_slice %0 {offsets = [53, 0], sizes = [1, 20], strides = [1, 1]} : vector<55x20xf32> to vector<1x20xf32>
    %5 = vector.extract_strided_slice %0 {offsets = [54, 0], sizes = [1, 3], strides = [1, 1]} : vector<55x20xf32> to vector<1x3xf32>
    %c0_1 = arith.constant 0 : index
    %c0_2 = arith.constant 0 : index
    %6 = vector.load %arg0[%c0_1, %c0_2] : memref<64x13xf32, #tpu.memory_space<vmem>>, vector<64x13xf32>
    %cst = arith.constant dense<0.000000e+00> : vector<64x20xf32>
    %7 = tpu.matmul %6, %1, %cst {dimension_numbers = #tpu.dot_dimension_numbers<[1], [0], [0], [1], [0, 0, 1, 1], [], []>} : vector<64x13xf32>, vector<13x20xf32>, vector<64x20xf32> -> vector<64x20xf32>
    %8 = vector.broadcast %4 : vector<1x20xf32> to vector<64x20xf32>
    %9 = arith.addf %7, %8 : vector<64x20xf32>
    %c0_3 = arith.constant 0 : index
    %c0_4 = arith.constant 0 : index
    %10 = vector.load %arg1[%c0_3, %c0_4] : memref<8x20xf32, #tpu.memory_space<vmem>>, vector<8x20xf32>
    %11 = vector.extract_strided_slice %9 {offsets = [0, 0], sizes = [8, 20], strides = [1, 1]} : vector<64x20xf32> to vector<8x20xf32>
    %cst_5 = arith.constant dense<0.000000e+00> : vector<8x20xf32>
    %12 = tpu.matmul %10, %2, %cst_5 {dimension_numbers = #tpu.dot_dimension_numbers<[1], [0], [0], [1], [0, 0, 1, 1], [], []>} : vector<8x20xf32>, vector<20x20xf32>, vector<8x20xf32> -> vector<8x20xf32>
    %13 = arith.addf %11, %12 : vector<8x20xf32>
    %14 = math.tanh %13 : vector<8x20xf32>
    %15 = vector.extract_strided_slice %9 {offsets = [8, 0], sizes = [8, 20], strides = [1, 1]} : vector<64x20xf32> to vector<8x20xf32>
    %cst_6 = arith.constant dense<0.000000e+00> : vector<8x20xf32>
    %16 = tpu.matmul %14, %2, %cst_6 {dimension_numbers = #tpu.dot_dimension_numbers<[1], [0], [0], [1], [0, 0, 1, 1], [], []>} : vector<8x20xf32>, vector<20x20xf32>, vector<8x20xf32> -> vector<8x20xf32>
    %17 = arith.addf %15, %16 : vector<8x20xf32>
    %18 = math.tanh %17 : vector<8x20xf32>
    %19 = vector.extract_strided_slice %9 {offsets = [16, 0], sizes = [8, 20], strides = [1, 1]} : vector<64x20xf32> to vector<8x20xf32>
    %cst_7 = arith.constant dense<0.000000e+00> : vector<8x20xf32>
    %20 = tpu.matmul %18, %2, %cst_7 {dimension_numbers = #tpu.dot_dimension_numbers<[1], [0], [0], [1], [0, 0, 1, 1], [], []>} : vector<8x20xf32>, vector<20x20xf32>, vector<8x20xf32> -> vector<8x20xf32>
    %21 = arith.addf %19, %20 : vector<8x20xf32>
    %22 = math.tanh %21 : vector<8x20xf32>
    %23 = vector.extract_strided_slice %9 {offsets = [24, 0], sizes = [8, 20], strides = [1, 1]} : vector<64x20xf32> to vector<8x20xf32>
    %cst_8 = arith.constant dense<0.000000e+00> : vector<8x20xf32>
    %24 = tpu.matmul %22, %2, %cst_8 {dimension_numbers = #tpu.dot_dimension_numbers<[1], [0], [0], [1], [0, 0, 1, 1], [], []>} : vector<8x20xf32>, vector<20x20xf32>, vector<8x20xf32> -> vector<8x20xf32>
    %25 = arith.addf %23, %24 : vector<8x20xf32>
    %26 = math.tanh %25 : vector<8x20xf32>
    %27 = vector.extract_strided_slice %9 {offsets = [32, 0], sizes = [8, 20], strides = [1, 1]} : vector<64x20xf32> to vector<8x20xf32>
    %cst_9 = arith.constant dense<0.000000e+00> : vector<8x20xf32>
    %28 = tpu.matmul %26, %2, %cst_9 {dimension_numbers = #tpu.dot_dimension_numbers<[1], [0], [0], [1], [0, 0, 1, 1], [], []>} : vector<8x20xf32>, vector<20x20xf32>, vector<8x20xf32> -> vector<8x20xf32>
    %29 = arith.addf %27, %28 : vector<8x20xf32>
    %30 = math.tanh %29 : vector<8x20xf32>
    %31 = vector.extract_strided_slice %9 {offsets = [40, 0], sizes = [8, 20], strides = [1, 1]} : vector<64x20xf32> to vector<8x20xf32>
    %cst_10 = arith.constant dense<0.000000e+00> : vector<8x20xf32>
    %32 = tpu.matmul %30, %2, %cst_10 {dimension_numbers = #tpu.dot_dimension_numbers<[1], [0], [0], [1], [0, 0, 1, 1], [], []>} : vector<8x20xf32>, vector<20x20xf32>, vector<8x20xf32> -> vector<8x20xf32>
    %33 = arith.addf %31, %32 : vector<8x20xf32>
    %34 = math.tanh %33 : vector<8x20xf32>
    %35 = vector.extract_strided_slice %9 {offsets = [48, 0], sizes = [8, 20], strides = [1, 1]} : vector<64x20xf32> to vector<8x20xf32>
    %cst_11 = arith.constant dense<0.000000e+00> : vector<8x20xf32>
    %36 = tpu.matmul %34, %2, %cst_11 {dimension_numbers = #tpu.dot_dimension_numbers<[1], [0], [0], [1], [0, 0, 1, 1], [], []>} : vector<8x20xf32>, vector<20x20xf32>, vector<8x20xf32> -> vector<8x20xf32>
    %37 = arith.addf %35, %36 : vector<8x20xf32>
    %38 = math.tanh %37 : vector<8x20xf32>
    %39 = vector.extract_strided_slice %9 {offsets = [56, 0], sizes = [8, 20], strides = [1, 1]} : vector<64x20xf32> to vector<8x20xf32>
    %cst_12 = arith.constant dense<0.000000e+00> : vector<8x20xf32>
    %40 = tpu.matmul %38, %2, %cst_12 {dimension_numbers = #tpu.dot_dimension_numbers<[1], [0], [0], [1], [0, 0, 1, 1], [], []>} : vector<8x20xf32>, vector<20x20xf32>, vector<8x20xf32> -> vector<8x20xf32>
    %41 = arith.addf %39, %40 : vector<8x20xf32>
    %42 = math.tanh %41 : vector<8x20xf32>
    %c0_13 = arith.constant 0 : index
    %c0_14 = arith.constant 0 : index
    %43 = vector.load %arg4[%c0_13, %c0_14] : memref<8x20xf32, #tpu.memory_space<vmem>>, vector<8x20xf32>
    tpu.vector_store %arg4[%c0_13, %c0_14], %42 {strides = array<i32>} : memref<8x20xf32, #tpu.memory_space<vmem>>, vector<8x20xf32>,
    %cst_15 = arith.constant dense<0.000000e+00> : vector<8x3xf32>
    %44 = tpu.matmul %42, %3, %cst_15 {dimension_numbers = #tpu.dot_dimension_numbers<[1], [0], [0], [1], [0, 0, 1, 1], [], []>} : vector<8x20xf32>, vector<20x3xf32>, vector<8x3xf32> -> vector<8x3xf32>
    %45 = vector.broadcast %5 : vector<1x3xf32> to vector<8x3xf32>
    %46 = arith.addf %44, %45 : vector<8x3xf32>
    %c0_16 = arith.constant 0 : index
    %c0_17 = arith.constant 0 : index
    %47 = vector.load %arg3[%c0_16, %c0_17] : memref<8x3xf32, #tpu.memory_space<vmem>>, vector<8x3xf32>
    tpu.vector_store %arg3[%c0_16, %c0_17], %46 {strides = array<i32>} : memref<8x3xf32, #tpu.memory_space<vmem>>, vector<8x3xf32>,
    return
  }
}

</mosaic_0001>

<bundles_post_ra>
// kernel: rnn_forward.1
= control target key start
LH: loop header
LB: loop body
LE: loop exit
PB: predicated region body
PF: predicated region fallthrough
CT: control target
= control target key end

     0   :  { %vm60_vm0 = vcmask 1044480   ;;  %vm35_vm1 = vcmask 105472   ;;  %vm173_vm2 = vcmask 1042432   ;;  %v1110_v7 = vmov 0.0|0.0   ;;  %s1302_s2 = inlined_call_operand.vmem [shape: f32[55,20], index: 2, kind: input, shape index: {}]   ;;  %s1303_s0 = inlined_call_operand.vmem [shape: f32[64,13], index: 0, kind: input, shape index: {}]   ;;  %s1304_s1 = inlined_call_operand.vmem [shape: f32[8,20], index: 1, kind: input, shape index: {}]   ;;  %s1305_s4 = inlined_call_operand.vmem [shape: f32[8,20], index: 4, kind: output, shape index: {1}]   ;;  %s1306_s3 = inlined_call_operand.vmem [shape: f32[8,3], index: 3, kind: output, shape index: {0}]  }
   0x1   :  { %v16_v0 = vld [vmem:[%s1302_s2] sm:$0xff]  ;;  %v17_v1 = vld [vmem:[%s1302_s2 + $0x8] sm:$0xff]  ;;  %v18_v2 = vld [vmem:[%s1302_s2 + $0x10] sm:$0xff]  ;;  %1063 = vmatprep.subr.bf16.mxu1 %v1110_v7  ;;  %vm1111_vm3 = vmmov 1   ;;  %vm1112_vm5 = vmmov 0   ;;  %v1113_v15 = vmov 0.0   ;;  %v31_v19 = vlaneseq }
   0x2   :  { %v19_v3 = vld [vmem:[%s1302_s2 + $0x18] sm:$0xff]  ;;  %v1154_v4 = vld [vmem:[%s1302_s2 + $0x20] sm:$0xff]  ;;  %v1057_v5 = vpack.c.bf16 %v17_v1, %v16_v0  ;;  %v174_v6 = vrot.slane %v17_v1, 5  ;;  %vm1058_vm4 = vmpackc.low %vm60_vm0, %vm1111_vm3  ;;  %v175_v8 = vrot.slane %v18_v2, 5  ;;  %982 = vmatprep.mubr.msk.f32.mxu1 %vm1112_vm5, %v1113_v15  ;;  %vm187_vm6 = vcmask 1043456  }
   0x3   :  { %v177_v9 = vrot.slane %v19_v3, 5  ;;  %v23_v10 = vld [vmem:[%s1303_s0] sm:$0xff]  ;;  %v179_v13 = vrot.slane %v1154_v4, 5  ;;  %v24_v14 = vld [vmem:[%s1303_s0 + $0x8] sm:$0xff]  ;;  %vm183_vm7 = vcmask 162816   ;;  %v1197_v20 = vshrl.u32 %v31_v19, 7 }
   0x4   :  { %1059 = vmatprep.subr.msk.bf16.mxu0 %vm1058_vm4, %v1057_v5  ;;  %964 = vmatprep.mubr.msk.f32.mxu0 %vm35_vm1, %v23_v10  ;;  %v176_v11 = vsel %vm173_vm2, %v174_v6, %v175_v8  ;;  %v169_v18 = vld [vmem:[%s1304_s1] sm:$0xff]  ;;  %v1203_v22 = vld [vmem:[%s1302_s2 + $0x30] sm:$0x7f]  ;;  %v26_v32 = vld [vmem:[%s1303_s0 + $0x18] sm:$0xff]  ;;  %vm794_vm8 = vcmask 1046528   ;;  %vm877_vm9 = vcmask 23552  }
   0x5   :  { %v178_v12 = vsel %vm173_vm2, %v175_v8, %v177_v9  ;;  %1062 = vmatpush3.bf16.msk.msra.mxu0 %vm1058_vm4, %v1057_v5  ;;  %v1175_v17 = vsel %vm173_vm2, %v177_v9, %v179_v13  ;;  %v33_v21 = vsub.s32 5, %v1197_v20  ;;  %v25_v31 = vld [vmem:[%s1303_s0 + $0x10] sm:$0xff]  ;;  %v27_v40 = vld [vmem:[%s1303_s0 + $0x20] sm:$0xff]  ;;  %v28_v41 = vld [vmem:[%s1303_s0 + $0x28] sm:$0xff]  ;;  %v798_v13 = vrot.slane %v1203_v22, 1 }
   0x6   :  { %v1169_v16 = vpack.c.bf16 %v178_v12, %v176_v11  ;;  %1072 = vmatprep.subr.bf16.mxu0 %v1110_v7  ;;  %v29_v42 = vld [vmem:[%s1303_s0 + $0x30] sm:$0xff]  ;;  %v30_v43 = vld [vmem:[%s1303_s0 + $0x38] sm:$0xff]  ;;  %v21_v10 = vld [vmem:[%s1302_s2 + $0x28] sm:$0xff]  ;;  %v795_v11 = vrot.slane %v1154_v4, 1  ;;  %v790_v4 = vsub.s32 6, %v1197_v20 }
   0x7   :  { %v1206_v23 = vrot.slane %v1203_v22, %v33_v21  ;;  %v796_v12 = vrot.slane %v21_v10, 1 }
   0x8   :  { %1065 = vmatpush3.bf16.msra.mxu1 %v1169_v16  ;;  %965 = vmatmul.mubr.msk.f32.vlgmr.msra.gmra.mrb[0].mxu0 %vm35_vm1, %v24_v14 }
   0x9   :  { %980 = vmatprep.subr.mxu1 %v1113_v15  ;;  %1074 = vmatpush3.bf16.msra.mxu0 %v1169_v16  ;;  %v797_v14 = vsel %vm794_vm8, %v795_v11, %v796_v12 }
   0xa   :  { %1007 = vmatprep.subr.mxu0 %v1113_v15  ;;  %967 = vmatprep.mubr.msk.f32.mxu0 %vm35_vm1, %v25_v31 }
   0xc   :  { %981 = vmatpush3.msk.msra.mxu1 %vm187_vm6, %v1175_v17  ;;  %968 = vmatmul.mubr.msk.f32.gmra.mrb[2].mxu0 %vm35_vm1, %v26_v32 }
   0xd   :  { %983 = vmatmul.mubr.msk.f32.vlgmr.msra.gmra.mrb[0].mxu1 %vm183_vm7, %v169_v18  ;;  %1066 = vmatprep.subr.bf16.mxu1 %v1110_v7 }
   0xe   :  { %1068 = vmatpush3.bf16.msra.mxu1 %v1169_v16  ;;  %991 = vmatprep.mubr.msk.f32.mxu1 %vm1112_vm5, %v1113_v15 }
   0xf   :  { %989 = vmatprep.subr.mxu1 %v1113_v15  ;;  %1008 = vmatpush3.msk.msra.mxu0 %vm187_vm6, %v1175_v17 }
  0x10   :  { %1078 = vmatprep.subr.bf16.mxu0 %v1110_v7  ;;  %970 = vmatprep.mubr.msk.f32.mxu0 %vm35_vm1, %v27_v40 }
  0x11   :  { %971 = vmatmul.mubr.msk.f32.gmra.mrb[4].mxu0 %vm35_vm1, %v28_v41 }
  0x12   :  { %990 = vmatpush3.msk.msra.mxu1 %vm187_vm6, %v1175_v17  ;;  %973 = vmatprep.mubr.msk.f32.mxu0 %vm35_vm1, %v29_v42 }
  0x13   :  { %1069 = vmatprep.subr.bf16.mxu1 %v1110_v7 }
  0x15   :  { %974 = vmatmul.mubr.msk.f32.gmra.mrb[6].mxu0 %vm35_vm1, %v30_v43 }
  0x16   :  { %1009 = vmatprep.mubr.msk.f32.mxu0 %vm1112_vm5, %v1113_v15 }
  0xdb   :  { %v966_v24 = vpop.f32.mrb[0].mxu0 }
  0xdc   :  { %v130_v25 = vpop.f32.mrb[1].mxu0  ;;  %v136_v33 = vadd.f32 %v966_v24, %v1206_v23 }
  0xdd   :  { %v131_v26 = vadd.f32 %v130_v25, %v1206_v23 }
  0xdf   :  { %v969_v38 = vpop.f32.mrb[2].mxu0 }
  0xe0   :  { %v256_v27 = vpop.f32.mrb[0].mxu1  ;;  %v140_v39 = vpop.f32.mrb[3].mxu0  ;;  %v146_v53 = vadd.f32 %v969_v38, %v1206_v23 }
  0xe1   :  { %v260_v28 = vadd.f32 %v256_v27, %v131_v26  ;;  %v984_v29 = vpop.f32.mrb[1].mxu1  ;;  %v141_v44 = vadd.f32 %v140_v39, %v1206_v23 }
  0xe3   :  { %1094 = vtanh.f32 %v260_v28 }
  0xe4   :  { %v972_v49 = vpop.f32.mrb[4].mxu0 }
  0xe5   :  { %v150_v50 = vpop.f32.mrb[5].mxu0  ;;  %v156_v63 = vadd.f32 %v972_v49, %v1206_v23 }
  0xe6   :  { %v151_v58 = vadd.f32 %v150_v50, %v1206_v23 }
  0xe8   :  { %v975_v51 = vpop.f32.mrb[6].mxu0 }
  0xe9   :  { %v160_v52 = vpop.f32.mrb[7].mxu0  ;;  %v166_v18 = vadd.f32 %v975_v51, %v1206_v23 }
  0xea   :  { %v161_v5 = vadd.f32 %v160_v52, %v1206_v23 }
  0xed   :  { %v1095_v30 = vpop.eup %1094 }
  0xee   :  { %992 = vmatmul.mubr.msk.f32.vlgmr.msra.gmra.mrb[2].mxu1 %vm183_vm7, %v1095_v30 }
  0xef   :  { %1071 = vmatpush3.bf16.msra.mxu1 %v1169_v16  ;;  %1000 = vmatprep.mubr.msk.f32.mxu1 %vm1112_vm5, %v1113_v15 }
  0xf0   :  { %998 = vmatprep.subr.mxu1 %v1113_v15 }
  0xf3   :  { %999 = vmatpush3.msk.msra.mxu1 %vm187_vm6, %v1175_v17 }
  0xf4   :  { %1075 = vmatprep.subr.bf16.mxu1 %v1110_v7 }
 0x1c1   :  { %v331_v34 = vpop.f32.mrb[2].mxu1 }
 0x1c2   :  { %v335_v35 = vadd.f32 %v331_v34, %v136_v33  ;;  %v993_v36 = vpop.f32.mrb[3].mxu1 }
 0x1c4   :  { %1096 = vtanh.f32 %v335_v35 }
 0x1ce   :  { %v1097_v37 = vpop.eup %1096 }
 0x1cf   :  { %1001 = vmatmul.mubr.msk.f32.vlgmr.msra.gmra.mrb[4].mxu1 %vm183_vm7, %v1097_v37 }
 0x1d0   :  { %1077 = vmatpush3.bf16.msra.mxu1 %v1169_v16  ;;  %1018 = vmatprep.mubr.msk.f32.mxu1 %vm1112_vm5, %v1113_v15 }
 0x1d1   :  { %1016 = vmatprep.subr.mxu1 %v1113_v15 }
 0x1d4   :  { %1017 = vmatpush3.msk.msra.mxu1 %vm187_vm6, %v1175_v17 }
 0x1d5   :  { %1081 = vmatprep.subr.bf16.mxu1 %v1110_v7 }
 0x2a2   :  { %v406_v45 = vpop.f32.mrb[4].mxu1 }
 0x2a3   :  { %v410_v46 = vadd.f32 %v406_v45, %v141_v44  ;;  %v1002_v47 = vpop.f32.mrb[5].mxu1 }
 0x2a5   :  { %1098 = vtanh.f32 %v410_v46 }
 0x2af   :  { %v1099_v48 = vpop.eup %1098 }
 0x2b0   :  { %1010 = vmatmul.mubr.msk.f32.vlgmr.msra.gmra.mrb[8].mxu0 %vm183_vm7, %v1099_v48 }
 0x2b1   :  { %1080 = vmatpush3.bf16.msra.mxu0 %v1169_v16  ;;  %1027 = vmatprep.mubr.msk.f32.mxu0 %vm1112_vm5, %v1113_v15 }
 0x2b2   :  { %1025 = vmatprep.subr.mxu0 %v1113_v15 }
 0x2b5   :  { %1026 = vmatpush3.msk.msra.mxu0 %vm187_vm6, %v1175_v17 }
 0x2b6   :  { %1084 = vmatprep.subr.bf16.mxu0 %v1110_v7 }
 0x383   :  { %v481_v54 = vpop.f32.mrb[8].mxu0 }
 0x384   :  { %v485_v55 = vadd.f32 %v481_v54, %v146_v53  ;;  %v1011_v56 = vpop.f32.mrb[9].mxu0 }
 0x386   :  { %1100 = vtanh.f32 %v485_v55 }
 0x390   :  { %v1101_v57 = vpop.eup %1100 }
 0x391   :  { %1019 = vmatmul.mubr.msk.f32.vlgmr.msra.gmra.mrb[6].mxu1 %vm183_vm7, %v1101_v57 }
 0x392   :  { %1083 = vmatpush3.bf16.msra.mxu1 %v1169_v16  ;;  %1036 = vmatprep.mubr.msk.f32.mxu1 %vm1112_vm5, %v1113_v15 }
 0x393   :  { %1034 = vmatprep.subr.mxu1 %v1113_v15 }
 0x396   :  { %1035 = vmatpush3.msk.msra.mxu1 %vm187_vm6, %v1175_v17 }
 0x397   :  { %1087 = vmatprep.subr.bf16.mxu1 %v1110_v7 }
 0x464   :  { %v556_v59 = vpop.f32.mrb[6].mxu1 }
 0x465   :  { %v560_v60 = vadd.f32 %v556_v59, %v151_v58  ;;  %v1020_v61 = vpop.f32.mrb[7].mxu1 }
 0x467   :  { %1102 = vtanh.f32 %v560_v60 }
 0x471   :  { %v1103_v62 = vpop.eup %1102 }
 0x472   :  { %1028 = vmatmul.mubr.msk.f32.vlgmr.msra.gmra.mrb[10].mxu0 %vm183_vm7, %v1103_v62 }
 0x473   :  { %1086 = vmatpush3.bf16.msra.mxu0 %v1169_v16  ;;  %1045 = vmatprep.mubr.msk.f32.mxu0 %vm1112_vm5, %v1113_v15  ;;  %v799_v16 = vsel %vm794_vm8, %v796_v12, %v798_v13 }
 0x474   :  { %1043 = vmatprep.subr.mxu0 %v1113_v15 }
 0x477   :  { %1044 = vmatpush3.msk.msra.mxu0 %vm187_vm6, %v1175_v17  ;;  %v1088_v17 = vpack.c.bf16 %v799_v16, %v797_v14 }
 0x545   :  { %v631_v0 = vpop.f32.mrb[10].mxu0 }
 0x546   :  { %v635_v1 = vadd.f32 %v631_v0, %v156_v63  ;;  %v1029_v2 = vpop.f32.mrb[11].mxu0 }
 0x548   :  { %1104 = vtanh.f32 %v635_v1 }
 0x552   :  { %v1105_v3 = vpop.eup %1104 }
 0x553   :  { %1037 = vmatmul.mubr.msk.f32.vlgmr.msra.gmra.mrb[8].mxu1 %vm183_vm7, %v1105_v3 }
 0x554   :  { %1054 = vmatprep.mubr.msk.f32.mxu1 %vm1112_vm5, %v1113_v15  ;;  %1089 = vmatpush3.bf16.msra.mxu1 %v1088_v17 }
 0x555   :  { %1052 = vmatprep.subr.mxu1 %v1113_v15  ;;  %v791_v15 = vrot.slane %v1203_v22, %v790_v4 }
 0x558   :  { %1053 = vmatpush3.msk.msra.mxu1 %vm187_vm6, %v798_v13 }
 0x626   :  { %v706_v6 = vpop.f32.mrb[8].mxu1 }
 0x627   :  { %v710_v7 = vadd.f32 %v706_v6, %v161_v5  ;;  %v1038_v8 = vpop.f32.mrb[9].mxu1 }
 0x629   :  { %1106 = vtanh.f32 %v710_v7 }
 0x633   :  { %v1107_v9 = vpop.eup %1106 }
 0x634   :  { %1046 = vmatmul.mubr.msk.f32.vlgmr.msra.gmra.mrb[12].mxu0 %vm183_vm7, %v1107_v9 }
 0x707   :  { %v781_v19 = vpop.f32.mrb[12].mxu0 }
 0x708   :  { %v785_v21 = vadd.f32 %v781_v19, %v166_v18  ;;  %v1047_v24 = vpop.f32.mrb[13].mxu0 }
 0x70a   :  { %1108 = vtanh.f32 %v785_v21 }
 0x714   :  { %v1109_v25 = vpop.eup %1108 }
 0x715   :  { %787 = vst.msk [vmem:[%s1305_s4] sm:$0xff] %vm183_vm7, %v1109_v25  ;;  %1055 = vmatmul.mubr.msk.f32.vlgmr.msra.gmra.mrb[10].mxu1 %vm183_vm7, %v1109_v25 }
 0x7e8   :  { %v873_v26 = vpop.f32.mrb[10].mxu1 }
 0x7e9   :  { %v874_v27 = vadd.f32 %v873_v26, %v791_v15  ;;  %v1056_v23 = vpop.f32.mrb[11].mxu1 }
 0x7eb   :  { %878 = vst.msk [vmem:[%s1306_s3] sm:$0xff] %vm877_vm9, %v874_v27 }

</bundles_post_ra>
